<compile_context>
chip_gen: v6e
topology: v6e:2x2x1
jax: 0.10.0
libtpu: 0.0.40
codegen_flags: <defaults>
</compile_context>

<pallas_src>
import functools
import inspect

import jax
import jax.numpy as jnp
from jax.experimental import pallas as pl
from jax.experimental.pallas import tpu as pltpu


# ----------------------------- small helpers -------------------------------

def _round_up(n, m):
    return ((n + m - 1) // m) * m


def _pad2d(a, rows, cols):
    return jnp.pad(a.astype(jnp.float32),
                   ((0, rows - a.shape[0]), (0, cols - a.shape[1])))


def _leaky_relu(x, negative_slope=0.2):
    return jnp.where(x >= 0, x, negative_slope * x)


def _const_spec(shape):
    """Grid-invariant block (weights/biases). Index map never changes, so
    request single buffering when the installed Pallas supports it."""
    idx_map = lambda i: (0, 0)
    if hasattr(pl, "Buffered"):
        try:
            if "pipeline_mode" in inspect.signature(pl.BlockSpec).parameters:
                return pl.BlockSpec(shape, idx_map,
                                    pipeline_mode=pl.Buffered(1))
        except (TypeError, ValueError):
            pass
    return pl.BlockSpec(shape, idx_map)


def _grid_semantics():
    """CORE_PARALLEL on dual-TC v7x so both TensorCores split the batch grid;
    plain 'parallel' on single-TC v5e/v6e (and anything unknown)."""
    try:
        kind = jax.devices()[0].device_kind.lower()
    except Exception:  # pragma: no cover - no devices visible
        kind = ""
    if (("v7" in kind) or ("tpu7" in kind)) and hasattr(pltpu, "CORE_PARALLEL"):
        return (pltpu.CORE_PARALLEL,)
    return ("parallel",)


# --------------------------------- kernel ----------------------------------

def classifier_kernel(x_ref, w1_ref, b1_ref, w2_ref, b2_ref, w3_ref, b3_ref,
                      out_ref):
    x = x_ref[...]  # (tb, latent), f32

    # fc1 + LeakyReLU(0.2)   (hidden padded to 128 lanes; padding is exact)
    h1 = jnp.dot(x, w1_ref[...], preferred_element_type=jnp.float32,
                 precision=jax.lax.Precision.HIGHEST)
    h1 = _leaky_relu(h1 + b1_ref[...])

    # fc2 + LeakyReLU(0.2)
    h2 = jnp.dot(h1, w2_ref[...], preferred_element_type=jnp.float32,
                 precision=jax.lax.Precision.HIGHEST)
    h2 = _leaky_relu(h2 + b2_ref[...])

    # fc3 + Sigmoid  -- narrow (tb, out_dim) store, no padded writeback
    h3 = jnp.dot(h2, w3_ref[...], preferred_element_type=jnp.float32,
                 precision=jax.lax.Precision.HIGHEST)
    out_ref[...] = jax.nn.sigmoid(h3 + b3_ref[...]).astype(out_ref.dtype)


# ------------------------------ host wrappers -------------------------------

def prepare_params(params):
    """Pad hidden widths (100->128, 50->128) ONCE, outside the hot path.
    Weight layout: (in_features, out_features); biases (1, out_features).
    The last layer's output width is left unpadded so the kernel's output
    store is exactly sized (zero padding elsewhere is mathematically exact:
    LeakyReLU(0)=0 and padded rows/cols of the weights are zero)."""
    w1, b1 = params["w1"], params["b1"]
    w2, b2 = params["w2"], params["b2"]
    w3, b3 = params["w3"], params["b3"]
    latent, h1 = w1.shape
    h2 = w2.shape[1]
    out_dim = w3.shape[1]
    H1P, H2P = _round_up(h1, 128), _round_up(h2, 128)
    return {
        "w1": _pad2d(w1, latent, H1P), "b1": _pad2d(b1, 1, H1P),
        "w2": _pad2d(w2, H1P, H2P),    "b2": _pad2d(b2, 1, H2P),
        "w3": _pad2d(w3, H2P, out_dim), "b3": b3.astype(jnp.float32),
    }


@functools.partial(jax.jit, static_argnames=("out_dim", "tile_b"))
def classifier_forward(x, padded_params, *, out_dim, tile_b=2048):
    """x: (batch, latent) float32. padded_params: output of prepare_params."""
    w1p, b1p = padded_params["w1"], padded_params["b1"]
    w2p, b2p = padded_params["w2"], padded_params["b2"]
    w3p, b3p = padded_params["w3"], padded_params["b3"]

    batch, latent = x.shape
    H1P, H2P = w1p.shape[1], w2p.shape[1]

    # ---- batch tiling: big tiles to amortize ~0.35 us per-step overhead ----
    tb = min(_round_up(tile_b, 8), _round_up(batch, 8))
    tb = min(tb, 8192)  # hard cap (v7x: 64 MiB physical VMEM)

    def vmem_need(t):
        lane = lambda n: _round_up(max(n, 1), 128)
        x_tile = 2 * t * lane(latent) * 4           # double-buffered input
        o_tile = 2 * t * lane(out_dim) * 4          # double-buffered output
        acts = 3 * t * max(H1P, H2P) * 4            # h1/h2/h3 temporaries
        wbytes = 2 * 4 * (latent * H1P + H1P + H1P * H2P + H2P
                          + H2P * lane(out_dim) + lane(out_dim))
        return x_tile + o_tile + acts + wbytes

    VMEM_BUDGET = 44 << 20  # safe under v7x's 64 MiB physical
    while vmem_need(tb) > VMEM_BUDGET and tb > 256:
        tb = max(256, (tb // 16) * 8)  # halve, keep multiple of 8

    padded_batch = _round_up(batch, tb)
    # Avoid a wrapper-side pad pass over x in the common (divisible) case.
    xk = x if padded_batch == batch else jnp.pad(
        x, ((0, padded_batch - batch), (0, 0)))

    grid = (padded_batch // tb,)
    vmem_limit = int(min(max(vmem_need(tb) + (4 << 20), 32 << 20), 48 << 20))

    flops = 2 * padded_batch * (latent * H1P + H1P * H2P + H2P * out_dim)
    transcendentals = padded_batch * out_dim  # sigmoid exp
    bytes_accessed = 4 * (padded_batch * (latent + out_dim)
                          + latent * H1P + H1P
                          + H1P * H2P + H2P
                          + H2P * out_dim + out_dim)

    # TODO(synk): optionally feed x / weights as bf16 (keeping f32 MXU
    # accumulation) to halve the dominant input HBM stream; kept f32 here for
    # bit-level parity with the f32 PyTorch reference.
    out = pl.pallas_call(
        classifier_kernel,
        out_shape=jax.ShapeDtypeStruct((padded_batch, out_dim), jnp.float32),
        grid=grid,
        in_specs=[
            pl.BlockSpec((tb, latent), lambda i: (i, 0)),   # x: batch-tiled
            _const_spec(w1p.shape), _const_spec(b1p.shape), # VMEM-resident
            _const_spec(w2p.shape), _const_spec(b2p.shape),
            _const_spec(w3p.shape), _const_spec(b3p.shape),
        ],
        out_specs=pl.BlockSpec((tb, out_dim), lambda i: (i, 0)),
        compiler_params=pltpu.CompilerParams(
            dimension_semantics=_grid_semantics(),
            vmem_limit_bytes=vmem_limit),
        cost_estimate=pl.CostEstimate(
            flops=flops,
            transcendentals=transcendentals,
            bytes_accessed=bytes_accessed),
    )(xk, w1p, b1p, w2p, b2p, w3p, b3p)

    return out if padded_batch == batch else out[:batch]


# --------------------------- init & pure-JAX ref ----------------------------

def init_params(key, latent_size, output_size):
    """nn.Linear-style U(-1/sqrt(fan_in), +1/sqrt(fan_in)) init.
    Weights stored as (in_features, out_features), biases as (1, out)."""
    dims = [(latent_size, 100), (100, 50), (50, output_size)]
    params = {}
    keys = jax.random.split(key, 2 * len(dims))
    for i, (fan_in, fan_out) in enumerate(dims):
        bound = 1.0 / jnp.sqrt(jnp.float32(fan_in))
        w = jax.random.uniform(keys[2 * i], (fan_in, fan_out),
                               minval=-bound, maxval=bound, dtype=jnp.float32)
        b = jax.random.uniform(keys[2 * i + 1], (1, fan_out),
                               minval=-bound, maxval=bound, dtype=jnp.float32)
        params[f"w{i + 1}"] = w
        params[f"b{i + 1}"] = b
    return params


def reference_forward(x, params):
    hi = jax.lax.Precision.HIGHEST
    h = jnp.dot(x, params["w1"], precision=hi) + params["b1"]
    h = jnp.where(h >= 0, h, 0.2 * h)
    h = jnp.dot(h, params["w2"], precision=hi) + params["b2"]
    h = jnp.where(h >= 0, h, 0.2 * h)
    h = jnp.dot(h, params["w3"], precision=hi) + params["b3"]
    return jax.nn.sigmoid(h)


if __name__ == "__main__":
    key = jax.random.PRNGKey(0)
    k_x, k_p = jax.random.split(key)

    batch, latent_size, output_size = 2, 32, 4
    x = jax.random.normal(k_x, (batch, latent_size), dtype=jnp.float32)
    params = init_params(k_p, latent_size, output_size)

    padded_params = prepare_params(params)        # once, outside the hot path
    out = classifier_forward(x, padded_params, out_dim=output_size)
    out = jax.block_until_ready(out)

    ref = reference_forward(x, params)
    assert out.shape == (batch, output_size)
    assert jnp.allclose(out, ref, atol=1e-5, rtol=1e-5), "mismatch vs reference"

    print("KERNEL_OK")
</pallas_src>

<mosaic_0001>
module attributes {stable_mosaic.version = 11 : i64} {
  func.func @classifier_kernel(%arg0: i32, %arg1: memref<8x32xf32, #tpu.memory_space<vmem>>, %arg2: memref<32x128xf32, #tpu.memory_space<vmem>>, %arg3: memref<1x128xf32, #tpu.memory_space<vmem>>, %arg4: memref<128x128xf32, #tpu.memory_space<vmem>>, %arg5: memref<1x128xf32, #tpu.memory_space<vmem>>, %arg6: memref<128x4xf32, #tpu.memory_space<vmem>>, %arg7: memref<1x4xf32, #tpu.memory_space<vmem>>, %arg8: memref<8x4xf32, #tpu.memory_space<vmem>>) attributes {dimension_semantics = [#tpu.dimension_semantics<parallel>], iteration_bounds = array<i64: 1>, scalar_prefetch = 0 : i64, scratch_operands = 0 : i64, tpu.core_type = #tpu.core_type<tc>, window_params = [{transform_indices = @transform_0, window_bounds = array<i64: 8, 32>}, {pipeline_mode = #tpu.pipeline_mode<synchronous>, transform_indices = @transform_1, window_bounds = array<i64: 32, 128>}, {pipeline_mode = #tpu.pipeline_mode<synchronous>, transform_indices = @transform_2, window_bounds = array<i64: 1, 128>}, {pipeline_mode = #tpu.pipeline_mode<synchronous>, transform_indices = @transform_3, window_bounds = array<i64: 128, 128>}, {pipeline_mode = #tpu.pipeline_mode<synchronous>, transform_indices = @transform_4, window_bounds = array<i64: 1, 128>}, {pipeline_mode = #tpu.pipeline_mode<synchronous>, transform_indices = @transform_5, window_bounds = array<i64: 128, 4>}, {pipeline_mode = #tpu.pipeline_mode<synchronous>, transform_indices = @transform_6, window_bounds = array<i64: 1, 4>}, {transform_indices = @transform_7, window_bounds = array<i64: 8, 4>}]} {
    %c0 = arith.constant 0 : index
    %c0_0 = arith.constant 0 : index
    %0 = vector.load %arg1[%c0, %c0_0] : memref<8x32xf32, #tpu.memory_space<vmem>>, vector<8x32xf32>
    %c0_1 = arith.constant 0 : index
    %c0_2 = arith.constant 0 : index
    %1 = vector.load %arg2[%c0_1, %c0_2] : memref<32x128xf32, #tpu.memory_space<vmem>>, vector<32x128xf32>
    %cst = arith.constant dense<0.000000e+00> : vector<8x128xf32>
    %2 = tpu.matmul %0, %1, %cst {dimension_numbers = #tpu.dot_dimension_numbers<[1], [0], [0], [1], [0, 0, 1, 1], [], []>, precision = #tpu.contract_precision<fp32>} : vector<8x32xf32>, vector<32x128xf32>, vector<8x128xf32> -> vector<8x128xf32>
    %c0_3 = arith.constant 0 : index
    %c0_4 = arith.constant 0 : index
    %3 = vector.load %arg3[%c0_3, %c0_4] : memref<1x128xf32, #tpu.memory_space<vmem>>, vector<1x128xf32>
    %4 = vector.broadcast %3 : vector<1x128xf32> to vector<8x128xf32>
    %5 = arith.addf %2, %4 : vector<8x128xf32>
    %cst_5 = arith.constant 0.000000e+00 : f32
    %6 = vector.broadcast %cst_5 : f32 to vector<8x128xf32>
    %7 = arith.cmpf oge, %5, %6 : vector<8x128xf32>
    %cst_6 = arith.constant 2.000000e-01 : f32
    %8 = vector.broadcast %cst_6 : f32 to vector<8x128xf32>
    %9 = arith.mulf %8, %5 : vector<8x128xf32>
    %10 = arith.select %7, %5, %9 : vector<8x128xi1>, vector<8x128xf32>
    %c0_7 = arith.constant 0 : index
    %c0_8 = arith.constant 0 : index
    %11 = vector.load %arg4[%c0_7, %c0_8] : memref<128x128xf32, #tpu.memory_space<vmem>>, vector<128x128xf32>
    %cst_9 = arith.constant dense<0.000000e+00> : vector<8x128xf32>
    %12 = tpu.matmul %10, %11, %cst_9 {dimension_numbers = #tpu.dot_dimension_numbers<[1], [0], [0], [1], [0, 0, 1, 1], [], []>, precision = #tpu.contract_precision<fp32>} : vector<8x128xf32>, vector<128x128xf32>, vector<8x128xf32> -> vector<8x128xf32>
    %c0_10 = arith.constant 0 : index
    %c0_11 = arith.constant 0 : index
    %13 = vector.load %arg5[%c0_10, %c0_11] : memref<1x128xf32, #tpu.memory_space<vmem>>, vector<1x128xf32>
    %14 = vector.broadcast %13 : vector<1x128xf32> to vector<8x128xf32>
    %15 = arith.addf %12, %14 : vector<8x128xf32>
    %cst_12 = arith.constant 0.000000e+00 : f32
    %16 = vector.broadcast %cst_12 : f32 to vector<8x128xf32>
    %17 = arith.cmpf oge, %15, %16 : vector<8x128xf32>
    %cst_13 = arith.constant 2.000000e-01 : f32
    %18 = vector.broadcast %cst_13 : f32 to vector<8x128xf32>
    %19 = arith.mulf %18, %15 : vector<8x128xf32>
    %20 = arith.select %17, %15, %19 : vector<8x128xi1>, vector<8x128xf32>
    %c0_14 = arith.constant 0 : index
    %c0_15 = arith.constant 0 : index
    %21 = vector.load %arg6[%c0_14, %c0_15] : memref<128x4xf32, #tpu.memory_space<vmem>>, vector<128x4xf32>
    %cst_16 = arith.constant dense<0.000000e+00> : vector<8x4xf32>
    %22 = tpu.matmul %20, %21, %cst_16 {dimension_numbers = #tpu.dot_dimension_numbers<[1], [0], [0], [1], [0, 0, 1, 1], [], []>, precision = #tpu.contract_precision<fp32>} : vector<8x128xf32>, vector<128x4xf32>, vector<8x4xf32> -> vector<8x4xf32>
    %c0_17 = arith.constant 0 : index
    %c0_18 = arith.constant 0 : index
    %23 = vector.load %arg7[%c0_17, %c0_18] : memref<1x4xf32, #tpu.memory_space<vmem>>, vector<1x4xf32>
    %24 = vector.broadcast %23 : vector<1x4xf32> to vector<8x4xf32>
    %25 = arith.addf %22, %24 : vector<8x4xf32>
    %26 = arith.negf %25 : vector<8x4xf32>
    %27 = math.exp %26 : vector<8x4xf32>
    %cst_19 = arith.constant 1.000000e+00 : f32
    %28 = vector.broadcast %cst_19 : f32 to vector<8x4xf32>
    %29 = arith.addf %28, %27 : vector<8x4xf32>
    %30 = arith.divf %28, %29 : vector<8x4xf32>
    %c0_20 = arith.constant 0 : index
    %c0_21 = arith.constant 0 : index
    %31 = vector.load %arg8[%c0_20, %c0_21] : memref<8x4xf32, #tpu.memory_space<vmem>>, vector<8x4xf32>
    tpu.vector_store %arg8[%c0_20, %c0_21], %30 {strides = array<i32>} : memref<8x4xf32, #tpu.memory_space<vmem>>, vector<8x4xf32>,
    return
  }
  func.func @transform_0(%arg0: i32) -> (i32, i32) {
    %c0_i32 = arith.constant 0 : i32
    %c0_i32_0 = arith.constant 0 : i32
    return %arg0, %c0_i32 : i32, i32
  }
  func.func @transform_1(%arg0: i32) -> (i32, i32) {
    %c0_i32 = arith.constant 0 : i32
    %c0_i32_0 = arith.constant 0 : i32
    %c0_i32_1 = arith.constant 0 : i32
    return %c0_i32, %c0_i32_0 : i32, i32
  }
  func.func @transform_2(%arg0: i32) -> (i32, i32) {
    %c0_i32 = arith.constant 0 : i32
    %c0_i32_0 = arith.constant 0 : i32
    %c0_i32_1 = arith.constant 0 : i32
    return %c0_i32, %c0_i32_0 : i32, i32
  }
  func.func @transform_3(%arg0: i32) -> (i32, i32) {
    %c0_i32 = arith.constant 0 : i32
    %c0_i32_0 = arith.constant 0 : i32
    %c0_i32_1 = arith.constant 0 : i32
    return %c0_i32, %c0_i32_0 : i32, i32
  }
  func.func @transform_4(%arg0: i32) -> (i32, i32) {
    %c0_i32 = arith.constant 0 : i32
    %c0_i32_0 = arith.constant 0 : i32
    %c0_i32_1 = arith.constant 0 : i32
    return %c0_i32, %c0_i32_0 : i32, i32
  }
  func.func @transform_5(%arg0: i32) -> (i32, i32) {
    %c0_i32 = arith.constant 0 : i32
    %c0_i32_0 = arith.constant 0 : i32
    %c0_i32_1 = arith.constant 0 : i32
    return %c0_i32, %c0_i32_0 : i32, i32
  }
  func.func @transform_6(%arg0: i32) -> (i32, i32) {
    %c0_i32 = arith.constant 0 : i32
    %c0_i32_0 = arith.constant 0 : i32
    %c0_i32_1 = arith.constant 0 : i32
    return %c0_i32, %c0_i32_0 : i32, i32
  }
  func.func @transform_7(%arg0: i32) -> (i32, i32) {
    %c0_i32 = arith.constant 0 : i32
    %c0_i32_0 = arith.constant 0 : i32
    return %arg0, %c0_i32 : i32, i32
  }
}

</mosaic_0001>

<bundles_post_ra>
// kernel: classifier_forward.1
= control target key start
LH: loop header
LB: loop body
LE: loop exit
PB: predicated region body
PF: predicated region fallthrough
CT: control target
= control target key end

     0   :  { %12 = vsyncpa [#allocation3], 0  ;;  %s2643_s24 = smov [#allocation2]   ;;  %s3601_s0 = inlined_call_operand.vmem [shape: f32[8,32], index: 0, kind: input, shape index: {}]   ;;  %s3602_s1 = inlined_call_operand.hbm [shape: f32[32,128], index: 1, kind: input, shape index: {}]   ;;  %s3603_s2 = inlined_call_operand.vmem [shape: f32[1,128], index: 2, kind: input, shape index: {}]   ;;  %s3604_s3 = inlined_call_operand.vmem [shape: f32[128,128], index: 3, kind: input, shape index: {}]   ;;  %s3605_s4 = inlined_call_operand.vmem [shape: f32[1,128], index: 4, kind: input, shape index: {}]   ;;  %s3606_s5 = inlined_call_operand.vmem [shape: f32[128,4], index: 5, kind: input, shape index: {}]   ;;  %s3607_s6 = inlined_call_operand.vmem [shape: f32[1,4], index: 6, kind: input, shape index: {}]   ;;  %s3608_s7 = inlined_call_operand.vmem [shape: f32[8,4], index: 7, kind: output, shape index: {}]  }
   0x1   :  { %s20_s25 = sshll.u32 %s2643_s24, 4  ;;  %s21_s25 = int_to_ptr.vmem [resolvable:$true] %s20_s25 }
   0x2   :  { %s2629_s26 = scalar_lea.vmem %s21_s25, 512  ;;  %p2634_p1 = scmp.lt.s32.totalorder %s21_s25, %s21_s25 }
   0x3   :  { %p2630_p0 = scmp.ne.s32.totalorder %s21_s25, %s2629_s26  ;;  %p2635_p2 = scmp.lt.s32.totalorder %s2629_s26, %s2629_s26 }
   0x5   :  { %p2636_p3 = por %p2635_p2, %p2634_p1 }
   0x7   :  { %p2637_p4 = pnand %p2636_p3, %p2630_p0 }
   0x9   :  { %2640 = shalt.err (!%p2637_p4)
}
   0xa   :  { %s2644_s27 = smov 128   ;;  %s2645_s28 = smov 8  }
   0xb   :  { %26 = dma.hbm_to_vmem [thread:$0]  %s3602_s1, 512, %s21_s25, [#allocation3], %s2644_s27, %s2644_s27, %s2645_s28  }
   0xc   :  { %2641 = dma.done.wait [#allocation3], 512  }
   0xd   :  { %2642 = vsyncadd [#allocation3], 4294966784  ;;  %v2646_v0 = vmov 0.0   ;;  %vm2647_vm0 = vmmov 0   ;;  %vm52_vm1 = vcmask 261120   ;;  %v44_v1 = vld [vmem:[#allocation2 + $0x18] sm:$0xff] }
   0xe   :  { %2126 = vmatprep.subr.mxu0 %v2646_v0  ;;  %2137 = vmatprep.subr.mxu1 %v2646_v0  ;;  %v43_v2 = vld [vmem:[#allocation2 + $0x10] sm:$0xff]  ;;  %v42_v3 = vld [vmem:[#allocation2 + $0x8] sm:$0xff]  ;;  %v2697_v4 = vand.u32 4294901760, %v44_v1  ;;  %v41_v7 = vld [vmem:[#allocation2] sm:$0xff]  ;;  %vm1881_vm4 = vcmask 31744  }
   0xf   :  { %2134 = vmatprep.mubr.msk.f32.mxu0 %vm2647_vm0, %v2646_v0  ;;  %2145 = vmatprep.mubr.msk.f32.mxu1 %vm2647_vm0, %v2646_v0  ;;  %v2699_v5 = vand.u32 4294901760, %v43_v2  ;;  %v2701_v6 = vand.u32 4294901760, %v42_v3  ;;  %v40_v8 = vld [vmem:[%s3601_s0] sm:$0xff]  ;;  %v2706_v9 = vand.u32 4294901760, %v41_v7  ;;  %v559_v32 = vld [vmem:[%s3604_s3 + $0x78] sm:$0xff]  ;;  %v558_v33 = vld [vmem:[%s3604_s3 + $0x70] sm:$0xff] }
  0x10   :  { %v54_v10 = vsel %vm52_vm1, %v40_v8, 0  ;;  %2127 = vmatpush3.msra.mxu0 %v2697_v4  ;;  %v161_v11 = vsub.f32 %v44_v1, %v2697_v4  ;;  %v2750_v34 = vand.u32 4294901760, %v559_v32  ;;  %v557_v35 = vld [vmem:[%s3604_s3 + $0x68] sm:$0xff]  ;;  %v2760_v36 = vand.u32 4294901760, %v558_v33  ;;  %v556_v50 = vld [vmem:[%s3604_s3 + $0x60] sm:$0xff]  ;;  %v555_v52 = vld [vmem:[%s3604_s3 + $0x58] sm:$0xff] }
  0x11   :  { %v2710_v12 = vand.u32 4294901760, %v54_v10  ;;  %v168_v13 = vsub.f32 %v43_v2, %v2699_v5  ;;  %v2714_v14 = vsub.f32 %v42_v3, %v2701_v6  ;;  %2128 = vmatprep.subr.mxu0 %v2646_v0  ;;  %v2718_v15 = vsub.f32 %v41_v7, %v2706_v9  ;;  %v554_v55 = vld [vmem:[%s3604_s3 + $0x50] sm:$0xff]  ;;  %v553_v59 = vld [vmem:[%s3604_s3 + $0x48] sm:$0xff]  ;;  %v552_v1 = vld [vmem:[%s3604_s3 + $0x40] sm:$0xff] }
  0x12   :  { %2129 = vmatpush3.msra.mxu0 %v2699_v5  ;;  %v162_v16 = vand.u32 4294901760, %v161_v11  ;;  %v2766_v37 = vsub.f32 %v559_v32, %v2750_v34  ;;  %v2768_v38 = vand.u32 4294901760, %v557_v35  ;;  %v2774_v39 = vsub.f32 %v558_v33, %v2760_v36  ;;  %v551_v7 = vld [vmem:[%s3604_s3 + $0x38] sm:$0xff] }
  0x13   :  { %v2722_v17 = vsub.f32 %v54_v10, %v2710_v12  ;;  %v169_v18 = vand.u32 4294901760, %v168_v13  ;;  %v176_v19 = vand.u32 4294901760, %v2714_v14  ;;  %2130 = vmatprep.subr.mxu0 %v2646_v0  ;;  %v183_v20 = vand.u32 4294901760, %v2718_v15 }
  0x14   :  { %2131 = vmatpush3.msra.mxu0 %v2701_v6  ;;  %v163_v21 = vsub.f32 %v161_v11, %v162_v16  ;;  %v661_v40 = vand.u32 4294901760, %v2766_v37  ;;  %v2783_v41 = vsub.f32 %v557_v35, %v2768_v38  ;;  %v668_v42 = vand.u32 4294901760, %v2774_v39 }
  0x15   :  { %v127_v22 = vand.u32 4294901760, %v2722_v17  ;;  %v170_v23 = vsub.f32 %v168_v13, %v169_v18  ;;  %v177_v24 = vsub.f32 %v2714_v14, %v176_v19  ;;  %2132 = vmatprep.subr.mxu0 %v2646_v0  ;;  %v184_v28 = vsub.f32 %v2718_v15, %v183_v20 }
  0x16   :  { %2133 = vmatpush3.msra.mxu0 %v2706_v9  ;;  %v164_v25 = vand.u32 4294901760, %v163_v21  ;;  %v662_v43 = vsub.f32 %v2766_v37, %v661_v40  ;;  %v675_v44 = vand.u32 4294901760, %v2783_v41  ;;  %v669_v45 = vsub.f32 %v2774_v39, %v668_v42 }
  0x17   :  { %v128_v26 = vsub.f32 %v2722_v17, %v127_v22  ;;  %v171_v27 = vand.u32 4294901760, %v170_v23  ;;  %2148 = vmatprep.subr.mxu0 %v2646_v0  ;;  %v178_v30 = vand.u32 4294901760, %v177_v24  ;;  %v185_v31 = vand.u32 4294901760, %v184_v28 }
  0x18   :  { %2138 = vmatpush3.msra.mxu1 %v164_v25  ;;  %v663_v46 = vand.u32 4294901760, %v662_v43  ;;  %v676_v47 = vsub.f32 %v2783_v41, %v675_v44  ;;  %v670_v48 = vand.u32 4294901760, %v669_v45  ;;  %v2829_v51 = vand.u32 4294901760, %v556_v50  ;;  %v548_v25 = vld [vmem:[%s3604_s3 + $0x20] sm:$0xff] }
  0x19   :  { %v129_v29 = vand.u32 4294901760, %v128_v26  ;;  %2139 = vmatprep.subr.mxu1 %v2646_v0  ;;  %v2837_v54 = vand.u32 4294901760, %v555_v52  ;;  %v2848_v58 = vand.u32 4294901760, %v554_v55  ;;  %v2862_v63 = vand.u32 4294901760, %v553_v59 }
  0x1a   :  { %2140 = vmatpush3.msra.mxu1 %v171_v27  ;;  %v677_v49 = vand.u32 4294901760, %v676_v47  ;;  %v2835_v53 = vsub.f32 %v556_v50, %v2829_v51 }
  0x1b   :  { %2135 = vmatmul.mubr.f32.vlgmr.msra.gmra.mxu0 %v129_v29  ;;  %2141 = vmatprep.subr.mxu1 %v2646_v0  ;;  %v2846_v57 = vsub.f32 %v555_v52, %v2837_v54  ;;  %v2860_v62 = vsub.f32 %v554_v55, %v2848_v58  ;;  %v2934_v29 = vand.u32 4294901760, %v548_v25  ;;  %v545_v55 = vld [vmem:[%s3604_s3 + $0x8] sm:$0xff] }
  0x1c   :  { %2149 = vmatpush3.msra.mxu0 %v161_v11  ;;  %2142 = vmatpush3.msra.mxu1 %v178_v30  ;;  %v682_v56 = vand.u32 4294901760, %v2835_v53  ;;  %v2887_v11 = vand.u32 4294901760, %v551_v7 }
  0x1d   :  { %2150 = vmatprep.subr.mxu0 %v2646_v0  ;;  %2143 = vmatprep.subr.mxu1 %v2646_v0  ;;  %v689_v61 = vand.u32 4294901760, %v2846_v57  ;;  %v2947_v43 = vsub.f32 %v548_v25, %v2934_v29 }
  0x1e   :  { %2151 = vmatpush3.msra.mxu0 %v168_v13  ;;  %2144 = vmatpush3.msra.mxu1 %v185_v31  ;;  %v683_v60 = vsub.f32 %v2835_v53, %v682_v56  ;;  %v550_v13 = vld [vmem:[%s3604_s3 + $0x30] sm:$0xff]  ;;  %v547_v31 = vld [vmem:[%s3604_s3 + $0x18] sm:$0xff] }
  0x1f   :  { %2152 = vmatprep.subr.mxu0 %v2646_v0  ;;  %2146 = vmatmul.mubr.f32.vlgmr.msra.gmra.mxu1 %v2710_v12  ;;  %v690_v3 = vsub.f32 %v2846_v57, %v689_v61  ;;  %v2950_v45 = vand.u32 4294901760, %v547_v31 }
  0x20   :  { %2153 = vmatpush3.msra.mxu0 %v2714_v14  ;;  %2159 = vmatprep.subr.mxu1 %v2646_v0  ;;  %v684_v2 = vand.u32 4294901760, %v683_v60 }
  0x21   :  { %2154 = vmatprep.subr.mxu0 %v2646_v0  ;;  %2160 = vmatpush3.msra.mxu1 %v2697_v4  ;;  %v691_v8 = vand.u32 4294901760, %v690_v3  ;;  %v2965_v52 = vsub.f32 %v547_v31, %v2950_v45 }
  0x22   :  { %2155 = vmatpush3.msra.mxu0 %v2718_v15  ;;  %2156 = vmatprep.mubr.msk.f32.mxu0 %vm2647_vm0, %v2646_v0 }
  0x23   :  { %2161 = vmatprep.subr.mxu1 %v2646_v0  ;;  %2170 = vmatprep.subr.mxu0 %v2646_v0  ;;  %v3612_v3 = vand.u32 4294901760, %v2965_v52 }
  0x24   :  { %2157 = vmatmul.mubr.f32.vlgmr.msra.gmra.mxu0 %v2722_v17  ;;  %2162 = vmatpush3.msra.mxu1 %v2699_v5  ;;  %v2903_v17 = vand.u32 4294901760, %v550_v13 }
  0x25   :  { %2171 = vmatpush3.msra.mxu0 %v162_v16  ;;  %2163 = vmatprep.subr.mxu1 %v2646_v0  ;;  %v2901_v16 = vsub.f32 %v551_v7, %v2887_v11  ;;  %v544_v7 = vld [vmem:[%s3604_s3] sm:$0xff] }
  0x26   :  { %2172 = vmatprep.subr.mxu0 %v2646_v0  ;;  %2164 = vmatpush3.msra.mxu1 %v2701_v6 }
  0x27   :  { %2173 = vmatpush3.msra.mxu0 %v169_v18  ;;  %2165 = vmatprep.subr.mxu1 %v2646_v0  ;;  %v717_v21 = vand.u32 4294901760, %v2901_v16 }
  0x28   :  { %2174 = vmatprep.subr.mxu0 %v2646_v0  ;;  %2166 = vmatpush3.msra.mxu1 %v2706_v9 }
  0x29   :  { %2167 = vmatprep.mubr.msk.f32.mxu1 %vm2647_vm0, %v2646_v0  ;;  %2175 = vmatpush3.msra.mxu0 %v176_v19  ;;  %v549_v19 = vld [vmem:[%s3604_s3 + $0x28] sm:$0xff]  ;;  %v718_v26 = vsub.f32 %v2901_v16, %v717_v21 }
  0x2a   :  { %2168 = vmatmul.mubr.f32.vlgmr.msra.gmra.mxu1 %v127_v22  ;;  %2176 = vmatprep.subr.mxu0 %v2646_v0  ;;  %v2914_v22 = vsub.f32 %v550_v13, %v2903_v17  ;;  %v2916_v23 = vand.u32 4294901760, %v549_v19 }
  0x2b   :  { %2181 = vmatprep.subr.mxu1 %v2646_v0  ;;  %2177 = vmatpush3.msra.mxu0 %v183_v20  ;;  %v719_v32 = vand.u32 4294901760, %v718_v26 }
  0x2c   :  { %2178 = vmatprep.mubr.msk.f32.mxu0 %vm2647_vm0, %v2646_v0  ;;  %2182 = vmatpush3.msra.mxu1 %v2697_v4  ;;  %v696_v4 = vand.u32 4294901760, %v2860_v62  ;;  %v724_v27 = vand.u32 4294901760, %v2914_v22  ;;  %v2932_v28 = vsub.f32 %v549_v19, %v2916_v23 }
  0x2d   :  { %2179 = vmatmul.mubr.f32.vlgmr.msra.gmra.mxu0 %v2710_v12  ;;  %2183 = vmatprep.subr.mxu1 %v2646_v0 }
  0x2e   :  { %2189 = vmatprep.mubr.msk.f32.mxu1 %vm2647_vm0, %v2646_v0  ;;  %2184 = vmatpush3.msra.mxu1 %v2699_v5  ;;  %v2874_v5 = vsub.f32 %v553_v59, %v2862_v63  ;;  %v725_v33 = vsub.f32 %v2914_v22, %v724_v27  ;;  %v3614_v35 = vand.u32 4294901760, %v2932_v28 }
  0x2f   :  { %2192 = vmatprep.subr.mxu0 %v2646_v0  ;;  %2185 = vmatprep.subr.mxu1 %v2646_v0 }
  0x30   :  { %2193 = vmatpush3.msra.mxu0 %v2750_v34  ;;  %2186 = vmatpush3.msra.mxu1 %v2701_v6  ;;  %v2877_v6 = vand.u32 4294901760, %v552_v1  ;;  %v703_v10 = vand.u32 4294901760, %v2874_v5  ;;  %v726_v47 = vand.u32 4294901760, %v725_v33 }
  0x31   :  { %2194 = vmatprep.subr.mxu0 %v2646_v0  ;;  %2187 = vmatprep.subr.mxu1 %v2646_v0 }
  0x32   :  { %2195 = vmatpush3.msra.mxu0 %v2760_v36  ;;  %2188 = vmatpush3.msra.mxu1 %v2706_v9  ;;  %v697_v9 = vsub.f32 %v2860_v62, %v696_v4  ;;  %v704_v15 = vsub.f32 %v2874_v5, %v703_v10 }
  0x33   :  { %2196 = vmatprep.subr.mxu0 %v2646_v0  ;;  %2190 = vmatmul.mubr.f32.vlgmr.msra.gmra.mxu1 %v2710_v12  ;;  %v2891_v12 = vsub.f32 %v552_v1, %v2877_v6 }
  0x34   :  { %2227 = vmatprep.subr.mxu1 %v2646_v0  ;;  %2197 = vmatpush3.msra.mxu0 %v2768_v38  ;;  %v698_v14 = vand.u32 4294901760, %v697_v9  ;;  %v705_v20 = vand.u32 4294901760, %v704_v15  ;;  %v746_v15 = vsub.f32 %v2965_v52, %v3612_v3 }
  0x35   :  { %2228 = vmatpush3.msra.mxu1 %v663_v46  ;;  %2198 = vmatprep.subr.mxu0 %v2646_v0  ;;  %v710_v18 = vand.u32 4294901760, %v2891_v12  ;;  %v546_v46 = vld [vmem:[%s3604_s3 + $0x10] sm:$0xff] }
  0x36   :  { %2229 = vmatprep.subr.mxu1 %v2646_v0  ;;  %2259 = vmatprep.mubr.msk.f32.mxu1 %vm2647_vm0, %v2646_v0  ;;  %v2961_v50 = vand.u32 4294901760, %v546_v46  ;;  %v747_v25 = vand.u32 4294901760, %v746_v15 }
  0x37   :  { %2230 = vmatpush3.msra.mxu1 %v670_v48  ;;  %2224 = vmatprep.mubr.msk.f32.mxu0 %vm2647_vm0, %v2646_v0  ;;  %v711_v24 = vsub.f32 %v2891_v12, %v710_v18  ;;  %v732_v48 = vsub.f32 %v2932_v28, %v3614_v35 }
  0x38   :  { %2231 = vmatprep.subr.mxu1 %v2646_v0  ;;  %2199 = vmatpush3.msra.mxu0 %v2829_v51  ;;  %v2976_v1 = vsub.f32 %v546_v46, %v2961_v50 }
  0x39   :  { %2232 = vmatpush3.msra.mxu1 %v677_v49  ;;  %2200 = vmatprep.subr.mxu0 %v2646_v0  ;;  %v712_v30 = vand.u32 4294901760, %v711_v24  ;;  %v3613_v49 = vand.u32 4294901760, %v2947_v43  ;;  %v733_v59 = vand.u32 4294901760, %v732_v48 }
  0x3a   :  { %2233 = vmatprep.subr.mxu1 %v2646_v0  ;;  %2201 = vmatpush3.msra.mxu0 %v2837_v54  ;;  %v3611_v9 = vand.u32 4294901760, %v2976_v1 }
  0x3b   :  { %2202 = vmatprep.subr.mxu0 %v2646_v0  ;;  %2234 = vmatpush3.msra.mxu1 %v684_v2  ;;  %v739_v60 = vsub.f32 %v2947_v43, %v3613_v49  ;;  %v2978_v2 = vand.u32 4294901760, %v545_v55 }
  0x3c   :  { %2203 = vmatpush3.msra.mxu0 %v2848_v58  ;;  %2235 = vmatprep.subr.mxu1 %v2646_v0  ;;  %v753_v19 = vsub.f32 %v2976_v1, %v3611_v9 }
  0x3d   :  { %2204 = vmatprep.subr.mxu0 %v2646_v0  ;;  %2236 = vmatpush3.msra.mxu1 %v691_v8  ;;  %v740_v8 = vand.u32 4294901760, %v739_v60  ;;  %v2989_v13 = vsub.f32 %v545_v55, %v2978_v2 }
  0x3e   :  { %2205 = vmatpush3.msra.mxu0 %v2862_v63  ;;  %2237 = vmatprep.subr.mxu1 %v2646_v0  ;;  %v754_v26 = vand.u32 4294901760, %v753_v19 }
  0x3f   :  { %2206 = vmatprep.subr.mxu0 %v2646_v0  ;;  %2238 = vmatpush3.msra.mxu1 %v698_v14  ;;  %v2991_v14 = vand.u32 4294901760, %v544_v7 }
  0x40   :  { %2207 = vmatpush3.msra.mxu0 %v2877_v6  ;;  %2239 = vmatprep.subr.mxu1 %v2646_v0 }
  0x41   :  { %2208 = vmatprep.subr.mxu0 %v2646_v0  ;;  %2240 = vmatpush3.msra.mxu1 %v705_v20  ;;  %v3610_v20 = vand.u32 4294901760, %v2989_v13  ;;  %v3004_v24 = vsub.f32 %v544_v7, %v2991_v14 }
  0x42   :  { %2209 = vmatpush3.msra.mxu0 %v2887_v11  ;;  %2241 = vmatprep.subr.mxu1 %v2646_v0 }
  0x43   :  { %2210 = vmatprep.subr.mxu0 %v2646_v0  ;;  %2242 = vmatpush3.msra.mxu1 %v712_v30  ;;  %v760_v30 = vsub.f32 %v2989_v13, %v3610_v20  ;;  %v3609_v31 = vand.u32 4294901760, %v3004_v24 }
  0x44   :  { %2211 = vmatpush3.msra.mxu0 %v2903_v17  ;;  %2243 = vmatprep.subr.mxu1 %v2646_v0 }
  0x45   :  { %2212 = vmatprep.subr.mxu0 %v2646_v0  ;;  %2244 = vmatpush3.msra.mxu1 %v719_v32  ;;  %v761_v32 = vand.u32 4294901760, %v760_v30  ;;  %v767_v33 = vsub.f32 %v3004_v24, %v3609_v31 }
  0x46   :  { %2213 = vmatpush3.msra.mxu0 %v2916_v23  ;;  %2245 = vmatprep.subr.mxu1 %v2646_v0 }
  0x47   :  { %2214 = vmatprep.subr.mxu0 %v2646_v0  ;;  %2246 = vmatpush3.msra.mxu1 %v726_v47  ;;  %v768_v46 = vand.u32 4294901760, %v767_v33 }
  0x48   :  { %2215 = vmatpush3.msra.mxu0 %v2934_v29  ;;  %2247 = vmatprep.subr.mxu1 %v2646_v0 }
  0x49   :  { %2216 = vmatprep.subr.mxu0 %v2646_v0  ;;  %2248 = vmatpush3.msra.mxu1 %v733_v59  ;;  %v1888_v59 = vld [vmem:[%s3603_s2] ss:$0 sm:$0xff] }
  0x4a   :  { %2217 = vmatpush3.msra.mxu0 %v2950_v45  ;;  %2249 = vmatprep.subr.mxu1 %v2646_v0 }
  0x4b   :  { %2218 = vmatprep.subr.mxu0 %v2646_v0  ;;  %2250 = vmatpush3.msra.mxu1 %v740_v8 }
  0x4c   :  { %2219 = vmatpush3.msra.mxu0 %v2961_v50  ;;  %2251 = vmatprep.subr.mxu1 %v2646_v0 }
  0x4d   :  { %2220 = vmatprep.subr.mxu0 %v2646_v0  ;;  %2252 = vmatpush3.msra.mxu1 %v747_v25 }
  0x4e   :  { %2221 = vmatpush3.msra.mxu0 %v2978_v2  ;;  %2253 = vmatprep.subr.mxu1 %v2646_v0 }
  0x4f   :  { %2222 = vmatprep.subr.mxu0 %v2646_v0  ;;  %2254 = vmatpush3.msra.mxu1 %v754_v26 }
  0x50   :  { %2223 = vmatpush3.msra.mxu0 %v2991_v14  ;;  %2255 = vmatprep.subr.mxu1 %v2646_v0 }
  0x51   :  { %2262 = vmatprep.subr.mxu0 %v2646_v0  ;;  %2256 = vmatpush3.msra.mxu1 %v761_v32 }
  0x52   :  { %2257 = vmatprep.subr.mxu1 %v2646_v0 }
  0x53   :  { %2258 = vmatpush3.msra.mxu1 %v768_v46 }
  0x54   :  { %2297 = vmatprep.subr.mxu1 %v2646_v0 }
  0xdb   :  { %v131_v47 = vpop.f32.mrf.mxu0 }
  0xdc   :  { %v132_v8 = vadd.f32 %v1888_v59, %v131_v47 }
  0xdd   :  { %v2136_v48 = vpop.f32.mrf.mxu0 }
  0xdf   :  { %v222_v55 = vpop.f32.mrf.mxu1 }
  0xe0   :  { %v223_v19 = vadd.f32 %v222_v55, %v132_v8 }
  0xe1   :  { %v2147_v60 = vpop.f32.mrf.mxu1 }
  0xe4   :  { %v302_v7 = vpop.f32.mrf.mxu0 }
  0xe5   :  { %v303_v30 = vadd.f32 %v302_v7, %v223_v19  ;;  %v1218_v7 = vld [vmem:[%s3606_s5 + $0x38] sm:$0xff] }
  0xe6   :  { %v2158_v15 = vpop.f32.mrf.mxu0  ;;  %v3303_v19 = vand.u32 4294901760, %v1218_v7 }
  0xea   :  { %v379_v25 = vpop.f32.mrf.mxu1 }
  0xeb   :  { %v380_v33 = vadd.f32 %v379_v25, %v303_v30  ;;  %v1217_v25 = vld [vmem:[%s3606_s5 + $0x30] sm:$0xff] }
  0xec   :  { %v2169_v26 = vpop.f32.mrf.mxu1 }
  0xed   :  { %v462_v32 = vpop.f32.mrf.mxu0 }
  0xee   :  { %v463_v31 = vadd.f32 %v462_v32, %v380_v33  ;;  %v3313_v32 = vsub.f32 %v1218_v7, %v3303_v19  ;;  %v3315_v33 = vand.u32 4294901760, %v1217_v25 }
  0xef   :  { %v2180_v46 = vpop.f32.mrf.mxu0 }
  0xf0   :  { %v1216_v46 = vld [vmem:[%s3606_s5 + $0x28] sm:$0xff] }
  0xf3   :  { %v537_v20 = vpop.f32.mrf.mxu1 }
  0xf4   :  { %v538_v9 = vadd.f32 %v537_v20, %v463_v31  ;;  %v1219_v31 = vld [vmem:[%s3606_s5 + $0x40] sm:$0xff] }
  0xf5   :  { %v2191_v48 = vpop.f32.mrf.mxu1  ;;  %v3292_v59 = vand.u32 4294901760, %v1219_v31 }
  0xf6   :  { %vm541_vm2 = vcmp.ge.f32.partialorder %v538_v9, 0.0  ;;  %v542_v3 = vmul.f32 0.2, %v538_v9 }
  0xf7   :  { %v3301_v15 = vsub.f32 %v1219_v31, %v3292_v59  ;;  %v1211_v31 = vld [vmem:[%s3606_s5] sm:$0xff] }
  0xf8   :  { %v543_v49 = vsel %vm541_vm2, %v538_v9, %v542_v3 }
  0xf9   :  { %v3024_v35 = vand.u32 4294901760, %v543_v49  ;;  %v1377_v30 = vand.u32 4294901760, %v3301_v15 }
  0xfb   :  { %v3027_v60 = vsub.f32 %v543_v49, %v3024_v35  ;;  %2260 = vmatmul.mubr.f32.vlgmr.msra.gmra.mxu1 %v3024_v35  ;;  %v1378_v48 = vsub.f32 %v3301_v15, %v1377_v30 }
  0xfc   :  { %2298 = vmatpush3.msra.mxu1 %v2750_v34  ;;  %2329 = vmatprep.mubr.msk.f32.mxu1 %vm2647_vm0, %v2646_v0 }
  0xfd   :  { %2299 = vmatprep.subr.mxu1 %v2646_v0  ;;  %v650_v20 = vand.u32 4294901760, %v3027_v60 }
  0xfe   :  { %2300 = vmatpush3.msra.mxu1 %v2760_v36 }
  0xff   :  { %2301 = vmatprep.subr.mxu1 %v2646_v0  ;;  %v651_v3 = vsub.f32 %v3027_v60, %v650_v20 }
 0x100   :  { %2302 = vmatpush3.msra.mxu1 %v2768_v38 }
 0x101   :  { %2303 = vmatprep.subr.mxu1 %v2646_v0  ;;  %v652_v49 = vand.u32 4294901760, %v651_v3  ;;  %v3330_v3 = vand.u32 4294901760, %v1216_v46 }
 0x102   :  { %2304 = vmatpush3.msra.mxu1 %v2829_v51 }
 0x103   :  { %2305 = vmatprep.subr.mxu1 %v2646_v0  ;;  %2225 = vmatmul.mubr.f32.vlgmr.msra.gmra.mxu0 %v652_v49  ;;  %v1215_v49 = vld [vmem:[%s3606_s5 + $0x20] sm:$0xff] }
 0x104   :  { %2263 = vmatpush3.msra.mxu0 %v2766_v37  ;;  %2306 = vmatpush3.msra.mxu1 %v2837_v54  ;;  %v3621_v37 = vand.u32 4294901760, %v2965_v52 }
 0x105   :  { %2264 = vmatprep.subr.mxu0 %v2646_v0  ;;  %2307 = vmatprep.subr.mxu1 %v2646_v0 }
 0x106   :  { %2265 = vmatpush3.msra.mxu0 %v2774_v39  ;;  %2308 = vmatpush3.msra.mxu1 %v2848_v58  ;;  %v3623_v39 = vand.u32 4294901760, %v2989_v13 }
 0x107   :  { %2266 = vmatprep.subr.mxu0 %v2646_v0  ;;  %2309 = vmatprep.subr.mxu1 %v2646_v0 }
 0x108   :  { %2267 = vmatpush3.msra.mxu0 %v2783_v41  ;;  %2310 = vmatpush3.msra.mxu1 %v2862_v63  ;;  %v1226_v41 = vld [vmem:[%s3606_s5 + $0x78] sm:$0xff] }
 0x109   :  { %2268 = vmatprep.subr.mxu0 %v2646_v0  ;;  %2311 = vmatprep.subr.mxu1 %v2646_v0 }
 0x10a   :  { %2269 = vmatpush3.msra.mxu0 %v2835_v53  ;;  %2312 = vmatpush3.msra.mxu1 %v2877_v6  ;;  %v1223_v53 = vld [vmem:[%s3606_s5 + $0x60] sm:$0xff] }
 0x10b   :  { %2270 = vmatprep.subr.mxu0 %v2646_v0  ;;  %2313 = vmatprep.subr.mxu1 %v2646_v0 }
 0x10c   :  { %2271 = vmatpush3.msra.mxu0 %v2846_v57  ;;  %2314 = vmatpush3.msra.mxu1 %v2887_v11 }
 0x10d   :  { %2272 = vmatprep.subr.mxu0 %v2646_v0  ;;  %2315 = vmatprep.subr.mxu1 %v2646_v0 }
 0x10e   :  { %2273 = vmatpush3.msra.mxu0 %v2860_v62  ;;  %2316 = vmatpush3.msra.mxu1 %v2903_v17  ;;  %v1221_v62 = vld [vmem:[%s3606_s5 + $0x50] sm:$0xff] }
 0x10f   :  { %2274 = vmatprep.subr.mxu0 %v2646_v0  ;;  %2317 = vmatprep.subr.mxu1 %v2646_v0 }
 0x110   :  { %2275 = vmatpush3.msra.mxu0 %v2874_v5  ;;  %2318 = vmatpush3.msra.mxu1 %v2916_v23  ;;  %v3227_v5 = vand.u32 4294901760, %v1221_v62 }
 0x111   :  { %2276 = vmatprep.subr.mxu0 %v2646_v0  ;;  %2319 = vmatprep.subr.mxu1 %v2646_v0 }
 0x112   :  { %2277 = vmatpush3.msra.mxu0 %v2891_v12  ;;  %2320 = vmatpush3.msra.mxu1 %v2934_v29 }
 0x113   :  { %2278 = vmatprep.subr.mxu0 %v2646_v0  ;;  %2321 = vmatprep.subr.mxu1 %v2646_v0 }
 0x114   :  { %2279 = vmatpush3.msra.mxu0 %v2901_v16  ;;  %2322 = vmatpush3.msra.mxu1 %v2950_v45 }
 0x115   :  { %2280 = vmatprep.subr.mxu0 %v2646_v0  ;;  %2323 = vmatprep.subr.mxu1 %v2646_v0 }
 0x116   :  { %2281 = vmatpush3.msra.mxu0 %v2914_v22  ;;  %2324 = vmatpush3.msra.mxu1 %v2961_v50 }
 0x117   :  { %2282 = vmatprep.subr.mxu0 %v2646_v0  ;;  %2325 = vmatprep.subr.mxu1 %v2646_v0 }
 0x118   :  { %2283 = vmatpush3.msra.mxu0 %v2932_v28  ;;  %2326 = vmatpush3.msra.mxu1 %v2978_v2 }
 0x119   :  { %2284 = vmatprep.subr.mxu0 %v2646_v0  ;;  %2327 = vmatprep.subr.mxu1 %v2646_v0 }
 0x11a   :  { %2285 = vmatpush3.msra.mxu0 %v2947_v43  ;;  %2328 = vmatpush3.msra.mxu1 %v2991_v14 }
 0x11b   :  { %2286 = vmatprep.subr.mxu0 %v2646_v0  ;;  %2330 = vmatmul.mubr.f32.vlgmr.msra.gmra.mxu1 %v650_v20  ;;  %v3328_v20 = vsub.f32 %v1217_v25, %v3315_v33 }
 0x11c   :  { %2367 = vmatprep.subr.mxu1 %v2646_v0  ;;  %2287 = vmatpush3.msra.mxu0 %v2965_v52 }
 0x11d   :  { %2368 = vmatpush3.msra.mxu1 %v2750_v34  ;;  %2288 = vmatprep.subr.mxu0 %v2646_v0  ;;  %v3619_v34 = vand.u32 4294901760, %v2932_v28 }
 0x11e   :  { %2369 = vmatprep.subr.mxu1 %v2646_v0  ;;  %2289 = vmatpush3.msra.mxu0 %v2976_v1 }
 0x11f   :  { %2370 = vmatpush3.msra.mxu1 %v2760_v36  ;;  %2290 = vmatprep.subr.mxu0 %v2646_v0  ;;  %v3620_v36 = vand.u32 4294901760, %v2947_v43 }
 0x120   :  { %2371 = vmatprep.subr.mxu1 %v2646_v0  ;;  %2291 = vmatpush3.msra.mxu0 %v2989_v13 }
 0x121   :  { %2372 = vmatpush3.msra.mxu1 %v2768_v38  ;;  %2292 = vmatprep.subr.mxu0 %v2646_v0  ;;  %v3622_v38 = vand.u32 4294901760, %v2976_v1 }
 0x122   :  { %2373 = vmatprep.subr.mxu1 %v2646_v0  ;;  %2293 = vmatpush3.msra.mxu0 %v3004_v24 }
 0x123   :  { %2294 = vmatprep.mubr.msk.f32.mxu0 %vm2647_vm0, %v2646_v0  ;;  %2374 = vmatpush3.msra.mxu1 %v2829_v51  ;;  %v1224_v51 = vld [vmem:[%s3606_s5 + $0x68] sm:$0xff] }
 0x124   :  { %2295 = vmatmul.mubr.f32.vlgmr.msra.gmra.mxu0 %v3027_v60  ;;  %2332 = vmatprep.subr.mxu0 %v2646_v0  ;;  %v3210_v57 = vand.u32 4294901760, %v1224_v51  ;;  %v1384_v60 = vand.u32 4294901760, %v3313_v32 }
 0x125   :  { %2375 = vmatprep.subr.mxu1 %v2646_v0  ;;  %2333 = vmatpush3.msra.mxu0 %v661_v40  ;;  %v3624_v40 = vand.u32 4294901760, %v3004_v24 }
 0x126   :  { %2376 = vmatpush3.msra.mxu1 %v2837_v54  ;;  %2334 = vmatprep.subr.mxu0 %v2646_v0  ;;  %v3236_v12 = vsub.f32 %v1224_v51, %v3210_v57 }
 0x127   :  { %2377 = vmatprep.subr.mxu1 %v2646_v0  ;;  %2335 = vmatpush3.msra.mxu0 %v668_v42  ;;  %v3194_v42 = vand.u32 4294901760, %v1226_v41 }
 0x128   :  { %2378 = vmatpush3.msra.mxu1 %v2848_v58  ;;  %2336 = vmatprep.subr.mxu0 %v2646_v0  ;;  %v3212_v58 = vand.u32 4294901760, %v1223_v53 }
 0x129   :  { %2379 = vmatprep.subr.mxu1 %v2646_v0  ;;  %2337 = vmatpush3.msra.mxu0 %v675_v44  ;;  %v1225_v44 = vld [vmem:[%s3606_s5 + $0x70] sm:$0xff]  ;;  %v3206_v54 = vsub.f32 %v1226_v41, %v3194_v42 }
 0x12a   :  { %2380 = vmatpush3.msra.mxu1 %v2862_v63  ;;  %2338 = vmatprep.subr.mxu0 %v2646_v0  ;;  %v1220_v63 = vld [vmem:[%s3606_s5 + $0x48] sm:$0xff]  ;;  %v3239_v16 = vsub.f32 %v1223_v53, %v3212_v58 }
 0x12b   :  { %2381 = vmatprep.subr.mxu1 %v2646_v0  ;;  %2339 = vmatpush3.msra.mxu0 %v682_v56  ;;  %v3208_v56 = vand.u32 4294901760, %v1225_v44 }
 0x12c   :  { %2382 = vmatpush3.msra.mxu1 %v2877_v6  ;;  %2340 = vmatprep.subr.mxu0 %v2646_v0  ;;  %v3229_v6 = vand.u32 4294901760, %v1220_v63  ;;  %v1349_v28 = vand.u32 4294901760, %v3239_v16 }
 0x12d   :  { %2383 = vmatprep.subr.mxu1 %v2646_v0  ;;  %2341 = vmatpush3.msra.mxu0 %v689_v61  ;;  %v1222_v61 = vld [vmem:[%s3606_s5 + $0x58] sm:$0xff] }
 0x12e   :  { %2384 = vmatpush3.msra.mxu1 %v2887_v11  ;;  %2342 = vmatprep.subr.mxu0 %v2646_v0  ;;  %v3233_v11 = vsub.f32 %v1225_v44, %v3208_v56  ;;  %v1350_v52 = vsub.f32 %v3239_v16, %v1349_v28 }
 0x12f   :  { %2385 = vmatprep.subr.mxu1 %v2646_v0  ;;  %2343 = vmatpush3.msra.mxu0 %v696_v4  ;;  %v3224_v4 = vand.u32 4294901760, %v1222_v61 }
 0x130   :  { %2386 = vmatpush3.msra.mxu1 %v2903_v17  ;;  %2344 = vmatprep.subr.mxu0 %v2646_v0 }
 0x131   :  { %2387 = vmatprep.subr.mxu1 %v2646_v0  ;;  %2345 = vmatpush3.msra.mxu0 %v703_v10  ;;  %v1328_v10 = vand.u32 4294901760, %v3206_v54  ;;  %v3243_v17 = vsub.f32 %v1222_v61, %v3224_v4 }
 0x132   :  { %2388 = vmatpush3.msra.mxu1 %v2916_v23  ;;  %2346 = vmatprep.subr.mxu0 %v2646_v0  ;;  %v1335_v23 = vand.u32 4294901760, %v3233_v11 }
 0x133   :  { %2389 = vmatprep.subr.mxu1 %v2646_v0  ;;  %2347 = vmatpush3.msra.mxu0 %v710_v18  ;;  %v3246_v18 = vsub.f32 %v1221_v62, %v3227_v5  ;;  %v1329_v22 = vsub.f32 %v3206_v54, %v1328_v10  ;;  %v1213_v62 = vld [vmem:[%s3606_s5 + $0x10] sm:$0xff] }
 0x134   :  { %2390 = vmatpush3.msra.mxu1 %v2934_v29  ;;  %2348 = vmatprep.subr.mxu0 %v2646_v0  ;;  %v1356_v29 = vand.u32 4294901760, %v3243_v17 }
 0x135   :  { %2391 = vmatprep.subr.mxu1 %v2646_v0  ;;  %2349 = vmatpush3.msra.mxu0 %v717_v21  ;;  %v3250_v21 = vsub.f32 %v1220_v63, %v3229_v6  ;;  %v1330_v43 = vand.u32 4294901760, %v1329_v22 }
 0x136   :  { %2392 = vmatpush3.msra.mxu1 %v2950_v45  ;;  %2350 = vmatprep.subr.mxu0 %v2646_v0  ;;  %v1336_v45 = vsub.f32 %v3233_v11, %v1335_v23  ;;  %v1357_v9 = vsub.f32 %v3243_v17, %v1356_v29 }
 0x137   :  { %2393 = vmatprep.subr.mxu1 %v2646_v0  ;;  %2351 = vmatpush3.msra.mxu0 %v724_v27  ;;  %v1342_v27 = vand.u32 4294901760, %v3236_v12  ;;  %v1370_v13 = vand.u32 4294901760, %v3250_v21 }
 0x138   :  { %2394 = vmatpush3.msra.mxu1 %v2961_v50  ;;  %2352 = vmatprep.subr.mxu0 %v2646_v0  ;;  %v1337_v1 = vand.u32 4294901760, %v1336_v45  ;;  %v1358_v47 = vand.u32 4294901760, %v1357_v9  ;;  %v3373_v45 = vand.u32 4294901760, %v1213_v62 }
 0x139   :  { %2395 = vmatprep.subr.mxu1 %v2646_v0  ;;  %2353 = vmatpush3.msra.mxu0 %v3619_v34  ;;  %v1343_v50 = vsub.f32 %v3236_v12, %v1342_v27  ;;  %v1371_v55 = vsub.f32 %v3250_v21, %v1370_v13  ;;  %v1379_v34 = vand.u32 4294901760, %v1378_v48 }
 0x13a   :  { %2396 = vmatpush3.msra.mxu1 %v2978_v2  ;;  %2354 = vmatprep.subr.mxu0 %v2646_v0  ;;  %v3384_v9 = vsub.f32 %v1213_v62, %v3373_v45 }
 0x13b   :  { %2397 = vmatprep.subr.mxu1 %v2646_v0  ;;  %2355 = vmatpush3.msra.mxu0 %v3620_v36  ;;  %v1344_v2 = vand.u32 4294901760, %v1343_v50  ;;  %v1372_v26 = vand.u32 4294901760, %v1371_v55  ;;  %v1385_v36 = vsub.f32 %v3313_v32, %v1384_v60 }
 0x13c   :  { %2398 = vmatpush3.msra.mxu1 %v2991_v14  ;;  %2399 = vmatprep.mubr.msk.f32.mxu1 %vm2647_vm0, %v2646_v0  ;;  %v1351_v14 = vand.u32 4294901760, %v1350_v52  ;;  %v1212_v52 = vld [vmem:[%s3606_s5 + $0x8] sm:$0xff]  ;;  %v3617_v55 = vand.u32 4294901760, %v3384_v9 }
 0x13d   :  { %2356 = vmatprep.subr.mxu0 %v2646_v0  ;;  %2400 = vmatmul.mubr.f32.vlgmr.msra.gmra.mxu1 %v3024_v35  ;;  %v1386_v41 = vand.u32 4294901760, %v1385_v36 }
 0x13e   :  { %2357 = vmatpush3.msra.mxu0 %v3621_v37  ;;  %2364 = vmatprep.mubr.msk.f32.mxu0 %vm2647_vm0, %v2646_v0  ;;  %v1391_v37 = vand.u32 4294901760, %v3328_v20 }
 0x13f   :  { %2358 = vmatprep.subr.mxu0 %v2646_v0  ;;  %2437 = vmatprep.subr.mxu1 %v2646_v0 }
 0x140   :  { %2359 = vmatpush3.msra.mxu0 %v3622_v38  ;;  %2469 = vmatprep.mubr.msk.f32.mxu1 %vm2647_vm0, %v2646_v0  ;;  %v3343_v38 = vsub.f32 %v1216_v46, %v3330_v3  ;;  %v1392_v44 = vsub.f32 %v3328_v20, %v1391_v37  ;;  %v1420_v46 = vsub.f32 %v3384_v9, %v3617_v55 }
 0x141   :  { %2360 = vmatprep.subr.mxu0 %v2646_v0  ;;  %2438 = vmatpush3.msra.mxu1 %v1330_v43 }
 0x142   :  { %2361 = vmatpush3.msra.mxu0 %v3623_v39  ;;  %2439 = vmatprep.subr.mxu1 %v2646_v0  ;;  %v3347_v39 = vand.u32 4294901760, %v1215_v49  ;;  %v1398_v51 = vand.u32 4294901760, %v3343_v38  ;;  %v1393_v63 = vand.u32 4294901760, %v1392_v44 }
 0x143   :  { %2362 = vmatprep.subr.mxu0 %v2646_v0  ;;  %2440 = vmatpush3.msra.mxu1 %v1337_v1 }
 0x144   :  { %2363 = vmatpush3.msra.mxu0 %v3624_v40  ;;  %2441 = vmatprep.subr.mxu1 %v2646_v0  ;;  %v1214_v40 = vld [vmem:[%s3606_s5 + $0x18] sm:$0xff]  ;;  %v3361_v61 = vsub.f32 %v1215_v49, %v3347_v39  ;;  %v1399_v22 = vsub.f32 %v3343_v38, %v1398_v51 }
 0x145   :  { %2365 = vmatmul.mubr.f32.vlgmr.msra.gmra.mxu0 %v3024_v35  ;;  %2402 = vmatprep.subr.mxu0 %v2646_v0  ;;  %v1363_v35 = vand.u32 4294901760, %v3246_v18  ;;  %v3357_v53 = vand.u32 4294901760, %v1214_v40 }
 0x146   :  { %2434 = vmatprep.mubr.msk.f32.mxu0 %vm2647_vm0, %v2646_v0  ;;  %2403 = vmatpush3.msra.mxu0 %v3194_v42  ;;  %v1405_v50 = vand.u32 4294901760, %v3361_v61  ;;  %v1400_v1 = vand.u32 4294901760, %v1399_v22 }
 0x147   :  { %2404 = vmatprep.subr.mxu0 %v2646_v0  ;;  %v1364_v24 = vsub.f32 %v3246_v18, %v1363_v35  ;;  %2442 = vmatpush3.msra.mxu1 %v1344_v2  ;;  %v3371_v43 = vsub.f32 %v1214_v40, %v3357_v53 }
 0x148   :  { %2405 = vmatpush3.msra.mxu0 %v3208_v56  ;;  %2443 = vmatprep.subr.mxu1 %v2646_v0 }
 0x149   :  { %2406 = vmatprep.subr.mxu0 %v2646_v0  ;;  %2444 = vmatpush3.msra.mxu1 %v1351_v14  ;;  %v1365_v8 = vand.u32 4294901760, %v1364_v24  ;;  %v3618_v2 = vand.u32 4294901760, %v3371_v43  ;;  %v3386_v14 = vand.u32 4294901760, %v1212_v52  ;;  %v1406_v24 = vsub.f32 %v3361_v61, %v1405_v50 }
 0x14a   :  { %2407 = vmatpush3.msra.mxu0 %v3210_v57  ;;  %2445 = vmatprep.subr.mxu1 %v2646_v0 }
 0x14b   :  { %2408 = vmatprep.subr.mxu0 %v2646_v0  ;;  %2446 = vmatpush3.msra.mxu1 %v1358_v47  ;;  %v1413_v47 = vsub.f32 %v3371_v43, %v3618_v2  ;;  %v3402_v7 = vsub.f32 %v1212_v52, %v3386_v14  ;;  %v1407_v25 = vand.u32 4294901760, %v1406_v24 }
 0x14c   :  { %2409 = vmatpush3.msra.mxu0 %v3212_v58  ;;  %2447 = vmatprep.subr.mxu1 %v2646_v0 }
 0x14d   :  { %2410 = vmatprep.subr.mxu0 %v2646_v0  ;;  %2448 = vmatpush3.msra.mxu1 %v1365_v8  ;;  %v3404_v8 = vand.u32 4294901760, %v1211_v31  ;;  %v3616_v48 = vand.u32 4294901760, %v3402_v7 }
 0x14e   :  { %2411 = vmatpush3.msra.mxu0 %v3224_v4  ;;  %2449 = vmatprep.subr.mxu1 %v2646_v0 }
 0x14f   :  { %2412 = vmatprep.subr.mxu0 %v2646_v0  ;;  %2450 = vmatpush3.msra.mxu1 %v1372_v26  ;;  %v1414_v26 = vand.u32 4294901760, %v1413_v47  ;;  %v3414_v49 = vsub.f32 %v1211_v31, %v3404_v8  ;;  %v1427_v36 = vsub.f32 %v3402_v7, %v3616_v48 }
 0x150   :  { %2413 = vmatpush3.msra.mxu0 %v3227_v5  ;;  %2451 = vmatprep.subr.mxu1 %v2646_v0 }
 0x151   :  { %2414 = vmatprep.subr.mxu0 %v2646_v0  ;;  %2452 = vmatpush3.msra.mxu1 %v1379_v34  ;;  %v1421_v34 = vand.u32 4294901760, %v1420_v46  ;;  %v3615_v40 = vand.u32 4294901760, %v3414_v49 }
 0x152   :  { %2415 = vmatpush3.msra.mxu0 %v3229_v6  ;;  %2453 = vmatprep.subr.mxu1 %v2646_v0 }
 0x153   :  { %2416 = vmatprep.subr.mxu0 %v2646_v0  ;;  %2454 = vmatpush3.msra.mxu1 %v1386_v41  ;;  %v1428_v41 = vand.u32 4294901760, %v1427_v36  ;;  %v1434_v44 = vsub.f32 %v3414_v49, %v3615_v40 }
 0x154   :  { %2417 = vmatpush3.msra.mxu0 %v3292_v59  ;;  %2455 = vmatprep.subr.mxu1 %v2646_v0 }
 0x155   :  { %2418 = vmatprep.subr.mxu0 %v2646_v0  ;;  %2456 = vmatpush3.msra.mxu1 %v1393_v63  ;;  %v1435_v62 = vand.u32 4294901760, %v1434_v44 }
 0x156   :  { %2419 = vmatpush3.msra.mxu0 %v3303_v19  ;;  %2457 = vmatprep.subr.mxu1 %v2646_v0 }
 0x157   :  { %2420 = vmatprep.subr.mxu0 %v2646_v0  ;;  %2458 = vmatpush3.msra.mxu1 %v1400_v1 }
 0x158   :  { %2421 = vmatpush3.msra.mxu0 %v3315_v33  ;;  %2459 = vmatprep.subr.mxu1 %v2646_v0 }
 0x159   :  { %2422 = vmatprep.subr.mxu0 %v2646_v0  ;;  %2460 = vmatpush3.msra.mxu1 %v1407_v25 }
 0x15a   :  { %2423 = vmatpush3.msra.mxu0 %v3330_v3  ;;  %2461 = vmatprep.subr.mxu1 %v2646_v0 }
 0x15b   :  { %2424 = vmatprep.subr.mxu0 %v2646_v0  ;;  %2462 = vmatpush3.msra.mxu1 %v1414_v26  ;;  %v1889_v26 = vld [vmem:[%s3605_s4] ss:$0 sm:$0xff] }
 0x15c   :  { %2425 = vmatpush3.msra.mxu0 %v3347_v39  ;;  %2463 = vmatprep.subr.mxu1 %v2646_v0 }
 0x15d   :  { %2426 = vmatprep.subr.mxu0 %v2646_v0  ;;  %2464 = vmatpush3.msra.mxu1 %v1421_v34 }
 0x15e   :  { %2427 = vmatpush3.msra.mxu0 %v3357_v53  ;;  %2465 = vmatprep.subr.mxu1 %v2646_v0 }
 0x15f   :  { %2428 = vmatprep.subr.mxu0 %v2646_v0  ;;  %2466 = vmatpush3.msra.mxu1 %v1428_v41 }
 0x160   :  { %2429 = vmatpush3.msra.mxu0 %v3373_v45  ;;  %2467 = vmatprep.subr.mxu1 %v2646_v0 }
 0x161   :  { %2430 = vmatprep.subr.mxu0 %v2646_v0  ;;  %2468 = vmatpush3.msra.mxu1 %v1435_v62 }
 0x162   :  { %2431 = vmatpush3.msra.mxu0 %v3386_v14  ;;  %2507 = vmatprep.subr.mxu1 %v2646_v0 }
 0x163   :  { %2432 = vmatprep.subr.mxu0 %v2646_v0 }
 0x164   :  { %2433 = vmatpush3.msra.mxu0 %v3404_v8 }
 0x165   :  { %2472 = vmatprep.subr.mxu0 %v2646_v0 }
 0x1bb   :  { %v805_v63 = vpop.f32.mrf.mxu1 }
 0x1bd   :  { %v2261_v22 = vpop.f32.mrf.mxu1 }
 0x1c3   :  { %v654_v52 = vpop.f32.mrf.mxu0 }
 0x1c4   :  { %v655_v46 = vadd.f32 %v1889_v26, %v654_v52 }
 0x1c5   :  { %v2226_v1 = vpop.f32.mrf.mxu0 }
 0x1c6   :  { %v806_v36 = vadd.f32 %v805_v63, %v655_v46 }
 0x1db   :  { %v998_v24 = vpop.f32.mrf.mxu1 }
 0x1dd   :  { %v2331_v31 = vpop.f32.mrf.mxu1 }
 0x1e4   :  { %v909_v47 = vpop.f32.mrf.mxu0 }
 0x1e5   :  { %v910_v44 = vadd.f32 %v909_v47, %v806_v36 }
 0x1e6   :  { %v2296_v25 = vpop.f32.mrf.mxu0 }
 0x1e7   :  { %v999_v62 = vadd.f32 %v998_v24, %v910_v44 }
 0x1fd   :  { %v1204_v34 = vpop.f32.mrf.mxu1 }
 0x1ff   :  { %v2401_v41 = vpop.f32.mrf.mxu1 }
 0x205   :  { %v1117_v40 = vpop.f32.mrf.mxu0 }
 0x206   :  { %v1118_v48 = vadd.f32 %v1117_v40, %v999_v62 }
 0x207   :  { %v2366_v55 = vpop.f32.mrf.mxu0 }
 0x208   :  { %v1205_v22 = vadd.f32 %v1204_v34, %v1118_v48 }
 0x20a   :  { %vm1208_vm3 = vcmp.ge.f32.partialorder %v1205_v22, 0.0  ;;  %v1209_v1 = vmul.f32 0.2, %v1205_v22 }
 0x20c   :  { %v1210_v2 = vsel %vm1208_vm3, %v1205_v22, %v1209_v1 }
 0x20d   :  { %v3434_v31 = vand.u32 4294901760, %v1210_v2 }
 0x20f   :  { %2470 = vmatmul.mubr.f32.vlgmr.msra.gmra.mxu1 %v3434_v31  ;;  %v3438_v25 = vsub.f32 %v1210_v2, %v3434_v31 }
 0x210   :  { %2508 = vmatpush3.msra.mxu1 %v3194_v42  ;;  %2539 = vmatprep.mubr.msk.f32.mxu1 %vm2647_vm0, %v2646_v0 }
 0x211   :  { %2509 = vmatprep.subr.mxu1 %v2646_v0  ;;  %v1317_v55 = vand.u32 4294901760, %v3438_v25 }
 0x212   :  { %2510 = vmatpush3.msra.mxu1 %v3208_v56 }
 0x213   :  { %2511 = vmatprep.subr.mxu1 %v2646_v0  ;;  %v1318_v48 = vsub.f32 %v3438_v25, %v1317_v55 }
 0x214   :  { %2512 = vmatpush3.msra.mxu1 %v3210_v57 }
 0x215   :  { %2513 = vmatprep.subr.mxu1 %v2646_v0  ;;  %v1319_v2 = vand.u32 4294901760, %v1318_v48 }
 0x216   :  { %2514 = vmatpush3.msra.mxu1 %v3212_v58 }
 0x217   :  { %2515 = vmatprep.subr.mxu1 %v2646_v0  ;;  %2435 = vmatmul.mubr.f32.vlgmr.msra.gmra.mxu0 %v1319_v2 }
 0x218   :  { %2473 = vmatpush3.msra.mxu0 %v3206_v54  ;;  %2516 = vmatpush3.msra.mxu1 %v3224_v4  ;;  %v3626_v54 = vand.u32 4294901760, %v3384_v9 }
 0x219   :  { %2474 = vmatprep.subr.mxu0 %v2646_v0  ;;  %2517 = vmatprep.subr.mxu1 %v2646_v0 }
 0x21a   :  { %2475 = vmatpush3.msra.mxu0 %v3233_v11  ;;  %2518 = vmatpush3.msra.mxu1 %v3227_v5 }
 0x21b   :  { %2476 = vmatprep.subr.mxu0 %v2646_v0  ;;  %2519 = vmatprep.subr.mxu1 %v2646_v0 }
 0x21c   :  { %2477 = vmatpush3.msra.mxu0 %v3236_v12  ;;  %2520 = vmatpush3.msra.mxu1 %v3229_v6 }
 0x21d   :  { %2478 = vmatprep.subr.mxu0 %v2646_v0  ;;  %2521 = vmatprep.subr.mxu1 %v2646_v0 }
 0x21e   :  { %2479 = vmatpush3.msra.mxu0 %v3239_v16  ;;  %2522 = vmatpush3.msra.mxu1 %v3292_v59 }
 0x21f   :  { %2480 = vmatprep.subr.mxu0 %v2646_v0  ;;  %2523 = vmatprep.subr.mxu1 %v2646_v0 }
 0x220   :  { %2481 = vmatpush3.msra.mxu0 %v3243_v17  ;;  %2524 = vmatpush3.msra.mxu1 %v3303_v19  ;;  %v1890_v17 = vld [vmem:[%s3607_s6] ss:$0 sm:$0xff] }
 0x221   :  { %2482 = vmatprep.subr.mxu0 %v2646_v0  ;;  %2525 = vmatprep.subr.mxu1 %v2646_v0 }
 0x222   :  { %2483 = vmatpush3.msra.mxu0 %v3246_v18  ;;  %2526 = vmatpush3.msra.mxu1 %v3315_v33 }
 0x223   :  { %2484 = vmatprep.subr.mxu0 %v2646_v0  ;;  %2527 = vmatprep.subr.mxu1 %v2646_v0 }
 0x224   :  { %2485 = vmatpush3.msra.mxu0 %v3250_v21  ;;  %2528 = vmatpush3.msra.mxu1 %v3330_v3 }
 0x225   :  { %2486 = vmatprep.subr.mxu0 %v2646_v0  ;;  %2529 = vmatprep.subr.mxu1 %v2646_v0 }
 0x226   :  { %2487 = vmatpush3.msra.mxu0 %v3301_v15  ;;  %2530 = vmatpush3.msra.mxu1 %v3347_v39 }
 0x227   :  { %2488 = vmatprep.subr.mxu0 %v2646_v0  ;;  %2531 = vmatprep.subr.mxu1 %v2646_v0 }
 0x228   :  { %2489 = vmatpush3.msra.mxu0 %v3313_v32  ;;  %2532 = vmatpush3.msra.mxu1 %v3357_v53 }
 0x229   :  { %2490 = vmatprep.subr.mxu0 %v2646_v0  ;;  %2533 = vmatprep.subr.mxu1 %v2646_v0 }
 0x22a   :  { %2491 = vmatpush3.msra.mxu0 %v3328_v20  ;;  %2534 = vmatpush3.msra.mxu1 %v3373_v45 }
 0x22b   :  { %2492 = vmatprep.subr.mxu0 %v2646_v0  ;;  %2535 = vmatprep.subr.mxu1 %v2646_v0 }
 0x22c   :  { %2493 = vmatpush3.msra.mxu0 %v3343_v38  ;;  %2536 = vmatpush3.msra.mxu1 %v3386_v14 }
 0x22d   :  { %2494 = vmatprep.subr.mxu0 %v2646_v0  ;;  %2537 = vmatprep.subr.mxu1 %v2646_v0 }
 0x22e   :  { %2495 = vmatpush3.msra.mxu0 %v3361_v61  ;;  %2538 = vmatpush3.msra.mxu1 %v3404_v8 }
 0x22f   :  { %2496 = vmatprep.subr.mxu0 %v2646_v0  ;;  %2540 = vmatmul.mubr.f32.vlgmr.msra.gmra.mxu1 %v1317_v55 }
 0x230   :  { %2577 = vmatprep.subr.mxu1 %v2646_v0  ;;  %2497 = vmatpush3.msra.mxu0 %v3371_v43 }
 0x231   :  { %2578 = vmatpush3.msra.mxu1 %v3194_v42  ;;  %2498 = vmatprep.subr.mxu0 %v2646_v0  ;;  %v3625_v42 = vand.u32 4294901760, %v3371_v43 }
 0x232   :  { %2579 = vmatprep.subr.mxu1 %v2646_v0  ;;  %2499 = vmatpush3.msra.mxu0 %v3384_v9 }
 0x233   :  { %2580 = vmatpush3.msra.mxu1 %v3208_v56  ;;  %2500 = vmatprep.subr.mxu0 %v2646_v0  ;;  %v3627_v56 = vand.u32 4294901760, %v3402_v7 }
 0x234   :  { %2581 = vmatprep.subr.mxu1 %v2646_v0  ;;  %2501 = vmatpush3.msra.mxu0 %v3402_v7 }
 0x235   :  { %2582 = vmatpush3.msra.mxu1 %v3210_v57  ;;  %2502 = vmatprep.subr.mxu0 %v2646_v0  ;;  %v3628_v57 = vand.u32 4294901760, %v3414_v49 }
 0x236   :  { %2583 = vmatprep.subr.mxu1 %v2646_v0  ;;  %2503 = vmatpush3.msra.mxu0 %v3414_v49 }
 0x237   :  { %2504 = vmatprep.mubr.msk.f32.mxu0 %vm2647_vm0, %v2646_v0  ;;  %2584 = vmatpush3.msra.mxu1 %v3212_v58 }
 0x238   :  { %2505 = vmatmul.mubr.f32.vlgmr.msra.gmra.mxu0 %v3438_v25  ;;  %2542 = vmatprep.subr.mxu0 %v2646_v0 }
 0x239   :  { %2585 = vmatprep.subr.mxu1 %v2646_v0  ;;  %2543 = vmatpush3.msra.mxu0 %v1328_v10 }
 0x23a   :  { %2586 = vmatpush3.msra.mxu1 %v3224_v4  ;;  %2544 = vmatprep.subr.mxu0 %v2646_v0 }
 0x23b   :  { %2587 = vmatprep.subr.mxu1 %v2646_v0  ;;  %2545 = vmatpush3.msra.mxu0 %v1335_v23 }
 0x23c   :  { %2588 = vmatpush3.msra.mxu1 %v3227_v5  ;;  %2546 = vmatprep.subr.mxu0 %v2646_v0 }
 0x23d   :  { %2589 = vmatprep.subr.mxu1 %v2646_v0  ;;  %2547 = vmatpush3.msra.mxu0 %v1342_v27 }
 0x23e   :  { %2590 = vmatpush3.msra.mxu1 %v3229_v6  ;;  %2548 = vmatprep.subr.mxu0 %v2646_v0 }
 0x23f   :  { %2591 = vmatprep.subr.mxu1 %v2646_v0  ;;  %2549 = vmatpush3.msra.mxu0 %v1349_v28 }
 0x240   :  { %2592 = vmatpush3.msra.mxu1 %v3292_v59  ;;  %2550 = vmatprep.subr.mxu0 %v2646_v0 }
 0x241   :  { %2593 = vmatprep.subr.mxu1 %v2646_v0  ;;  %2551 = vmatpush3.msra.mxu0 %v1356_v29 }
 0x242   :  { %2594 = vmatpush3.msra.mxu1 %v3303_v19  ;;  %2552 = vmatprep.subr.mxu0 %v2646_v0 }
 0x243   :  { %2595 = vmatprep.subr.mxu1 %v2646_v0  ;;  %2553 = vmatpush3.msra.mxu0 %v1363_v35 }
 0x244   :  { %2596 = vmatpush3.msra.mxu1 %v3315_v33  ;;  %2554 = vmatprep.subr.mxu0 %v2646_v0 }
 0x245   :  { %2597 = vmatprep.subr.mxu1 %v2646_v0  ;;  %2555 = vmatpush3.msra.mxu0 %v1370_v13 }
 0x246   :  { %2598 = vmatpush3.msra.mxu1 %v3330_v3  ;;  %2556 = vmatprep.subr.mxu0 %v2646_v0 }
 0x247   :  { %2599 = vmatprep.subr.mxu1 %v2646_v0  ;;  %2557 = vmatpush3.msra.mxu0 %v1377_v30 }
 0x248   :  { %2600 = vmatpush3.msra.mxu1 %v3347_v39  ;;  %2558 = vmatprep.subr.mxu0 %v2646_v0 }
 0x249   :  { %2601 = vmatprep.subr.mxu1 %v2646_v0  ;;  %2559 = vmatpush3.msra.mxu0 %v1384_v60 }
 0x24a   :  { %2602 = vmatpush3.msra.mxu1 %v3357_v53  ;;  %2560 = vmatprep.subr.mxu0 %v2646_v0 }
 0x24b   :  { %2603 = vmatprep.subr.mxu1 %v2646_v0  ;;  %2561 = vmatpush3.msra.mxu0 %v1391_v37 }
 0x24c   :  { %2604 = vmatpush3.msra.mxu1 %v3373_v45  ;;  %2562 = vmatprep.subr.mxu0 %v2646_v0 }
 0x24d   :  { %2605 = vmatprep.subr.mxu1 %v2646_v0  ;;  %2563 = vmatpush3.msra.mxu0 %v1398_v51 }
 0x24e   :  { %2606 = vmatpush3.msra.mxu1 %v3386_v14  ;;  %2564 = vmatprep.subr.mxu0 %v2646_v0 }
 0x24f   :  { %2607 = vmatprep.subr.mxu1 %v2646_v0  ;;  %2565 = vmatpush3.msra.mxu0 %v1405_v50 }
 0x250   :  { %2608 = vmatpush3.msra.mxu1 %v3404_v8  ;;  %2609 = vmatprep.mubr.msk.f32.mxu1 %vm2647_vm0, %v2646_v0 }
 0x251   :  { %2566 = vmatprep.subr.mxu0 %v2646_v0  ;;  %2610 = vmatmul.mubr.f32.vlgmr.msra.gmra.mxu1 %v3434_v31 }
 0x252   :  { %2567 = vmatpush3.msra.mxu0 %v3625_v42  ;;  %2574 = vmatprep.mubr.msk.f32.mxu0 %vm2647_vm0, %v2646_v0 }
 0x253   :  { %2568 = vmatprep.subr.mxu0 %v2646_v0 }
 0x254   :  { %2569 = vmatpush3.msra.mxu0 %v3626_v54 }
 0x255   :  { %2570 = vmatprep.subr.mxu0 %v2646_v0 }
 0x256   :  { %2571 = vmatpush3.msra.mxu0 %v3627_v56 }
 0x257   :  { %2572 = vmatprep.subr.mxu0 %v2646_v0 }
 0x258   :  { %2573 = vmatpush3.msra.mxu0 %v3628_v57 }
 0x259   :  { %2575 = vmatmul.mubr.f32.vlgmr.msra.gmra.mxu0 %v3434_v31 }
 0x2cf   :  { %v1472_v58 = vpop.f32.mrf.mxu1 }
 0x2d1   :  { %v2471_v4 = vpop.f32.mrf.mxu1 }
 0x2d7   :  { %v1321_v5 = vpop.f32.mrf.mxu0 }
 0x2d8   :  { %v1322_v18 = vadd.f32 %v1890_v17, %v1321_v5 }
 0x2d9   :  { %v2436_v6 = vpop.f32.mrf.mxu0 }
 0x2da   :  { %v1473_v0 = vadd.f32 %v1472_v58, %v1322_v18 }
 0x2ef   :  { %v1665_v10 = vpop.f32.mrf.mxu1 }
 0x2f1   :  { %v2541_v11 = vpop.f32.mrf.mxu1 }
 0x2f8   :  { %v1576_v12 = vpop.f32.mrf.mxu0 }
 0x2f9   :  { %v1577_v27 = vadd.f32 %v1576_v12, %v1473_v0 }
 0x2fa   :  { %v2506_v16 = vpop.f32.mrf.mxu0 }
 0x2fb   :  { %v1666_v28 = vadd.f32 %v1665_v10, %v1577_v27 }
 0x311   :  { %v1871_v21 = vpop.f32.mrf.mxu1 }
 0x313   :  { %v2611_v23 = vpop.f32.mrf.mxu1 }
 0x319   :  { %v1784_v29 = vpop.f32.mrf.mxu0 }
 0x31a   :  { %v1785_v35 = vadd.f32 %v1784_v29, %v1666_v28 }
 0x31b   :  { %v2576_v13 = vpop.f32.mrf.mxu0 }
 0x31c   :  { %v1872_v59 = vadd.f32 %v1871_v21, %v1785_v35 }
 0x31e   :  { %v1891_v15 = vmul.f32 -1.442695, %v1872_v59 }
 0x320   :  { %2617 = vpow2.f32 %v1891_v15 }
 0x32d   :  { %v2618_v19 = vpop.eup %2617 }
 0x32e   :  { %v1878_v30 = vadd.f32 1.0, %v2618_v19 }
 0x330   :  { %2619 = vrcp.f32 %v1878_v30 }
 0x33d   :  { %v2620_v32 = vpop.eup %2619 }
 0x33e   :  { %1882 = vst.msk [vmem:[%s3608_s7] sm:$0xff] %vm1881_vm4, %v2620_v32 }
 0x33f   :  { %1887 = vsyncpa [#allocation3], 1 }

</bundles_post_ra>
